<compile_context>
chip_gen: v7x
topology: tpu7x:2x2x1
jax: 0.10.0
libtpu: 0.0.40
codegen_flags: <defaults>
</compile_context>

<pallas_src>
import functools

import jax
import jax.numpy as jnp
from jax.experimental import pallas as pl
from jax.experimental.pallas import tpu as pltpu


# ------------------------------- helpers -----------------------------------

def _pick_tile(dim, target, align):
    """Largest multiple of `align` that divides `dim` and is <= target.
    Falls back to the full dim (always legal: block == full array extent)."""
    t = (min(dim, target) // align) * align
    while t >= align:
        if dim % t == 0:
            return t
        t -= align
    return dim


def _vmem_limit_bytes():
    # ~3/4 of physical VMEM, capped: leaves compiler-scratch headroom on v7x
    # (64 MiB physical) while letting v5e/v6e (128 MiB) use bigger tiles.
    try:
        cap = pltpu.get_tpu_info().vmem_capacity_bytes
    except Exception:
        cap = 64 * 1024 * 1024
    return int(min(cap * 3 // 4, 100 * 1024 * 1024))


def _cparams(dims):
    return pltpu.CompilerParams(dimension_semantics=dims,
                                vmem_limit_bytes=_vmem_limit_bytes())


# ----------------------------- Pallas kernels -------------------------------

def _rms_matmul_kernel(x_ref, w_ref, o_ref, acc_ref, ssq_ref, *, eps, d_model):
    """out = rmsnorm(x) @ (g*W), K-tiled.  The per-row rsqrt factor is pulled
    out of the (linear) matmul and applied once at finalize; the norm gain g
    is pre-folded into W at init, so the hot loop is just MXU + a tiny
    sum-of-squares accumulate."""
    k = pl.program_id(2)

    @pl.when(k == 0)
    def _():
        acc_ref[...] = jnp.zeros_like(acc_ref)
        ssq_ref[...] = jnp.zeros_like(ssq_ref)

    x = x_ref[...].astype(jnp.float32)                       # (TM, TK)
    acc_ref[...] += jnp.dot(x, w_ref[...].astype(jnp.float32),
                            preferred_element_type=jnp.float32)
    ssq_ref[...] += jnp.sum(x * x, axis=-1, keepdims=True)

    @pl.when(k == pl.num_programs(2) - 1)
    def _():
        inv = jax.lax.rsqrt(ssq_ref[...] * (1.0 / d_model) + eps)
        o_ref[...] = (acc_ref[...] * inv).astype(o_ref.dtype)


def _matmul_residual_kernel(a_ref, w_ref, r_ref, o_ref, acc_ref):
    """K-tiled matmul with f32 accumulator; residual added at finalize."""
    k = pl.program_id(2)

    @pl.when(k == 0)
    def _():
        acc_ref[...] = jnp.zeros_like(acc_ref)

    acc_ref[...] += jnp.dot(a_ref[...].astype(jnp.float32),
                            w_ref[...].astype(jnp.float32),
                            preferred_element_type=jnp.float32)

    @pl.when(k == pl.num_programs(2) - 1)
    def _():
        o_ref[...] = (acc_ref[...] + r_ref[...].astype(jnp.float32)
                      ).astype(o_ref.dtype)


def _flash_attn_kernel(q_ref, k_ref, v_ref, o_ref, qs_sc, m_sc, l_sc, acc_sc,
                       *, scale, t_valid, tk):
    """Flash-style online-softmax attention for one (batch, kv-head) group.
    Q block covers all n_rep query heads of the kv head, so each K/V tile is
    loaded once per group.  Scale is folded into Q once (t == 0).  The last KV
    tile is masked against the valid prefix length t_valid."""
    t = pl.program_id(2)
    _, n_rep, tq, hd = q_ref.shape
    r = n_rep * tq

    @pl.when(t == 0)
    def _():
        q = q_ref[0].astype(jnp.float32).reshape(r, hd)
        qs_sc[...] = q * scale
        m_sc[...] = jnp.full(m_sc.shape, -jnp.inf, m_sc.dtype)
        l_sc[...] = jnp.zeros(l_sc.shape, l_sc.dtype)
        acc_sc[...] = jnp.zeros(acc_sc.shape, acc_sc.dtype)

    k = k_ref[0].astype(jnp.float32)                          # (TK, hd)
    v = v_ref[0].astype(jnp.float32)                          # (TK, hd)
    s = jax.lax.dot_general(qs_sc[...], k, (((1,), (1,)), ((), ())),
                            preferred_element_type=jnp.float32)   # (R, TK)
    if t_valid % tk != 0:                                     # static: mask tail
        col = t * tk + jax.lax.broadcasted_iota(jnp.int32, s.shape, 1)
        s = jnp.where(col < t_valid, s, -1e30)

    m_new = jnp.maximum(m_sc[...], jnp.max(s, axis=-1, keepdims=True))
    alpha = jnp.exp(m_sc[...] - m_new)
    p = jnp.exp(s - m_new)
    l_sc[...] = alpha * l_sc[...] + jnp.sum(p, axis=-1, keepdims=True)
    acc_sc[...] = alpha * acc_sc[...] + jnp.dot(p, v,
                                                preferred_element_type=jnp.float32)
    m_sc[...] = m_new

    @pl.when(t == pl.num_programs(2) - 1)
    def _():
        inv = pl.reciprocal(l_sc[...], approx=True)           # EUP slot, ~free
        o_ref[0] = (acc_sc[...] * inv).reshape(n_rep, tq, hd).astype(o_ref.dtype)


def _ffn_kernel(h_ref, w1_ref, w3_ref, w2_ref, o_ref, xn_ref, acc_ref, *, eps):
    """Fused: rmsnorm(h) (once per row-tile, cached in VMEM) -> SwiGLU over an
    H-chunk -> accumulate @w2 -> +residual.  The hidden dim is a grid axis, so
    the (M, H) intermediate never exists.  Norm gain pre-folded into w1/w3."""
    j = pl.program_id(1)

    @pl.when(j == 0)
    def _():
        x = h_ref[...].astype(jnp.float32)
        ms = jnp.mean(x * x, axis=-1, keepdims=True)
        xn_ref[...] = x * jax.lax.rsqrt(ms + eps)
        acc_ref[...] = jnp.zeros_like(acc_ref)

    xn = xn_ref[...]
    a = jnp.dot(xn, w1_ref[...].astype(jnp.float32),
                preferred_element_type=jnp.float32)           # (TM, TH)
    b = jnp.dot(xn, w3_ref[...].astype(jnp.float32),
                preferred_element_type=jnp.float32)
    mid = (a * jax.nn.sigmoid(a)) * b                         # SiLU * gate
    acc_ref[...] += jnp.dot(mid, w2_ref[...].astype(jnp.float32),
                            preferred_element_type=jnp.float32)

    @pl.when(j == pl.num_programs(1) - 1)
    def _():
        o_ref[...] = (acc_ref[...] + h_ref[...].astype(jnp.float32)
                      ).astype(o_ref.dtype)


# --------------------------- pallas_call wrappers ----------------------------

def rms_matmul(x2d, w, eps, *, tm=256, tn=512, tk=512):
    M, D = x2d.shape
    _, N = w.shape
    TM = _pick_tile(M, tm, 8)
    TN = _pick_tile(N, tn, 128)
    TK = _pick_tile(D, tk, 128)
    return pl.pallas_call(
        functools.partial(_rms_matmul_kernel, eps=eps, d_model=D),
        out_shape=jax.ShapeDtypeStruct((M, N), x2d.dtype),
        grid=(M // TM, N // TN, D // TK),
        in_specs=[pl.BlockSpec((TM, TK), lambda i, j, k: (i, k)),
                  pl.BlockSpec((TK, TN), lambda i, j, k: (k, j))],
        out_specs=pl.BlockSpec((TM, TN), lambda i, j, k: (i, j)),
        scratch_shapes=[pltpu.VMEM((TM, TN), jnp.float32),
                        pltpu.VMEM((TM, 1), jnp.float32)],
        compiler_params=_cparams(("parallel", "parallel", "arbitrary")),
    )(x2d, w)


def matmul_residual(a, w, r, *, tm=256, tn=512, tk=512):
    M, K = a.shape
    _, N = w.shape
    TM = _pick_tile(M, tm, 8)
    TN = _pick_tile(N, tn, 128)
    TK = _pick_tile(K, tk, 128)
    return pl.pallas_call(
        _matmul_residual_kernel,
        out_shape=jax.ShapeDtypeStruct((M, N), r.dtype),
        grid=(M // TM, N // TN, K // TK),
        in_specs=[pl.BlockSpec((TM, TK), lambda i, j, k: (i, k)),
                  pl.BlockSpec((TK, TN), lambda i, j, k: (k, j)),
                  pl.BlockSpec((TM, TN), lambda i, j, k: (i, j))],
        out_specs=pl.BlockSpec((TM, TN), lambda i, j, k: (i, j)),
        scratch_shapes=[pltpu.VMEM((TM, TN), jnp.float32)],
        compiler_params=_cparams(("parallel", "parallel", "arbitrary")),
    )(a, w, r)


def flash_attention(qg, k_cache, v_cache, t_valid, *, tq=256, tk=512):
    """qg: (B*Hkv, n_rep, S, hd) grouped queries; caches: (Bmax*Hkv, maxT, hd).
    Only ceil(t_valid/TK) cache tiles are DMA'd; the tail is masked in-kernel."""
    BG, n_rep, S, hd = qg.shape
    maxT = k_cache.shape[1]
    TQ = _pick_tile(S, tq, 8)
    TK = _pick_tile(maxT, tk, 8)
    n_kv = pl.cdiv(t_valid, TK)
    R = n_rep * TQ
    scale = 1.0 / (hd ** 0.5)
    return pl.pallas_call(
        functools.partial(_flash_attn_kernel, scale=scale, t_valid=t_valid, tk=TK),
        out_shape=jax.ShapeDtypeStruct((BG, n_rep, S, hd), qg.dtype),
        grid=(BG, S // TQ, n_kv),
        in_specs=[pl.BlockSpec((1, n_rep, TQ, hd), lambda bg, qi, t: (bg, 0, qi, 0)),
                  pl.BlockSpec((1, TK, hd), lambda bg, qi, t: (bg, t, 0)),
                  pl.BlockSpec((1, TK, hd), lambda bg, qi, t: (bg, t, 0))],
        out_specs=pl.BlockSpec((1, n_rep, TQ, hd), lambda bg, qi, t: (bg, 0, qi, 0)),
        scratch_shapes=[pltpu.VMEM((R, hd), jnp.float32),   # scaled Q
                        pltpu.VMEM((R, 1), jnp.float32),    # m
                        pltpu.VMEM((R, 1), jnp.float32),    # l
                        pltpu.VMEM((R, hd), jnp.float32)],  # acc
        compiler_params=_cparams(("parallel", "parallel", "arbitrary")),
    )(qg, k_cache, v_cache)


def ffn_fused(h2d, w1g, w3g, w2, eps, *, tm=256, th=512):
    M, D = h2d.shape
    H = w1g.shape[1]
    TM = _pick_tile(M, tm, 8)
    TH = _pick_tile(H, th, 128)
    return pl.pallas_call(
        functools.partial(_ffn_kernel, eps=eps),
        out_shape=jax.ShapeDtypeStruct((M, D), h2d.dtype),
        grid=(M // TM, H // TH),
        in_specs=[pl.BlockSpec((TM, D), lambda i, j: (i, 0)),
                  pl.BlockSpec((D, TH), lambda i, j: (0, j)),
                  pl.BlockSpec((D, TH), lambda i, j: (0, j)),
                  pl.BlockSpec((TH, D), lambda i, j: (j, 0))],
        out_specs=pl.BlockSpec((TM, D), lambda i, j: (i, 0)),
        scratch_shapes=[pltpu.VMEM((TM, D), jnp.float32),    # normalized x
                        pltpu.VMEM((TM, D), jnp.float32)],   # w2 accumulator
        compiler_params=_cparams(("parallel", "arbitrary")),
    )(h2d, w1g, w3g, w2)


# ------------------------------ JAX glue ops --------------------------------

def apply_rotary(x, cos, sin):
    # x: (B, S, H, hd); cos/sin: (S, hd//2). Interleaved (even, odd) pairing —
    # matches torch.view_as_complex.  Only applied to the S fresh tokens.
    # TODO(synk): fuse into the QKV projection epilogue (de-interleaved layout
    # + pltpu.roll on the idle XLU slot).
    B, S, H, hd = x.shape
    xr = x.astype(jnp.float32).reshape(B, S, H, hd // 2, 2)
    xe, xo = xr[..., 0], xr[..., 1]
    c = cos[None, :, None, :]
    s = sin[None, :, None, :]
    oe = xe * c - xo * s
    oo = xe * s + xo * c
    out = jnp.stack([oe, oo], axis=-1).reshape(B, S, H, hd)
    return out.astype(x.dtype)


# ----------------------------- one-time init ---------------------------------

def prepare_params(params):
    """Hoisted out of the forward: fuse wq/wk/wv into one lane-dense weight and
    fold the RMSNorm gains into the following projections (init-time only)."""
    g_attn = params["attn_norm_w"].astype(jnp.float32)[:, None]
    g_ffn = params["ffn_norm_w"].astype(jnp.float32)[:, None]
    wqkv = jnp.concatenate([params["wq"], params["wk"], params["wv"]], axis=1)
    return dict(
        wqkv_n=(g_attn * wqkv.astype(jnp.float32)).astype(params["wq"].dtype),
        wo=params["wo"],
        w1_n=(g_ffn * params["w1"].astype(jnp.float32)).astype(params["w1"].dtype),
        w3_n=(g_ffn * params["w3"].astype(jnp.float32)).astype(params["w3"].dtype),
        w2=params["w2"],
    )


# ------------------------------ EncoderBlock --------------------------------

def encoder_block_forward(x, start_pos, cos, sin, cache_k, cache_v, fparams, cfg):
    """cache_k/cache_v layout: (max_batch, n_kv_heads, max_seq, head_dim) —
    exactly what attention reads, so no cache-wide transpose/copy."""
    B, S, D = x.shape
    Hq, Hkv, hd = cfg["n_heads"], cfg["n_kv_heads"], cfg["head_dim"]
    n_rep = Hq // Hkv
    eps = cfg["eps"]
    Nq, Nkv = Hq * hd, Hkv * hd

    x2d = x.reshape(B * S, D)

    # --- fused rmsnorm + single wide QKV projection (Pallas) ---
    qkv = rms_matmul(x2d, fparams["wqkv_n"], eps)
    xq = qkv[:, :Nq].reshape(B, S, Hq, hd)
    xk = qkv[:, Nq:Nq + Nkv].reshape(B, S, Hkv, hd)
    xv = qkv[:, Nq + Nkv:].reshape(B, S, Hkv, hd)

    xq = apply_rotary(xq, cos, sin)                                      # glue
    xk = apply_rotary(xk, cos, sin)                                      # glue

    # KV-cache update: only the S new tokens are transposed & written.
    # TODO(synk): true in-place update via buffer donation / a Pallas scatter
    # kernel with input_output_aliases.
    cache_k = jax.lax.dynamic_update_slice(
        cache_k, xk.transpose(0, 2, 1, 3).astype(cache_k.dtype), (0, 0, start_pos, 0))
    cache_v = jax.lax.dynamic_update_slice(
        cache_v, xv.transpose(0, 2, 1, 3).astype(cache_v.dtype), (0, 0, start_pos, 0))

    t_valid = start_pos + S

    # Group queries by kv head: (B*Hkv, n_rep, S, hd).  Cheap (new tokens only).
    # TODO(synk): write Q directly in this layout from the projection kernel.
    qg = (xq.reshape(B, S, Hkv, n_rep, hd)
            .transpose(0, 2, 3, 1, 4)
            .reshape(B * Hkv, n_rep, S, hd))
    kf = cache_k.reshape(-1, cache_k.shape[2], hd)   # free reshape (Bmax*Hkv, maxT, hd)
    vf = cache_v.reshape(-1, cache_v.shape[2], hd)

    attn = flash_attention(qg, kf, vf, t_valid)                          # Pallas
    attn2d = (attn.reshape(B, Hkv, n_rep, S, hd)
                  .transpose(0, 3, 1, 2, 4)
                  .reshape(B * S, Nq))

    h2d = matmul_residual(attn2d, fparams["wo"], x2d)                    # Pallas

    # --- fused rmsnorm + SwiGLU + w2 + residual (Pallas) ---
    out2d = ffn_fused(h2d, fparams["w1_n"], fparams["w3_n"], fparams["w2"], eps)

    return out2d.reshape(B, S, D), cache_k, cache_v


# ---------------------------- pure-JAX reference -----------------------------

def reference_forward(x, start_pos, cos, sin, cache_k, cache_v, params, cfg):
    """Torch-faithful reference; caches in the torch layout (B, T, Hkv, hd)."""
    B, S, D = x.shape
    Hq, Hkv, hd = cfg["n_heads"], cfg["n_kv_heads"], cfg["head_dim"]
    n_rep = Hq // Hkv
    eps = cfg["eps"]

    def rms(t, w):
        t32 = t.astype(jnp.float32)
        n = t32 * jax.lax.rsqrt(jnp.mean(t32 * t32, -1, keepdims=True) + eps)
        return w * n.astype(t.dtype)

    def rep_kv(t, r):
        if r == 1:
            return t
        b, s, kvh, d = t.shape
        return jnp.broadcast_to(t[:, :, :, None, :],
                                (b, s, kvh, r, d)).reshape(b, s, kvh * r, d)

    xn = rms(x, params["attn_norm_w"])
    xq = (xn @ params["wq"]).reshape(B, S, Hq, hd)
    xk = (xn @ params["wk"]).reshape(B, S, Hkv, hd)
    xv = (xn @ params["wv"]).reshape(B, S, Hkv, hd)
    xq = apply_rotary(xq, cos, sin)
    xk = apply_rotary(xk, cos, sin)

    cache_k = jax.lax.dynamic_update_slice(cache_k, xk, (0, start_pos, 0, 0))
    cache_v = jax.lax.dynamic_update_slice(cache_v, xv, (0, start_pos, 0, 0))
    keys = rep_kv(cache_k[:B, 0:start_pos + S], n_rep)
    values = rep_kv(cache_v[:B, 0:start_pos + S], n_rep)

    q = xq.transpose(0, 2, 1, 3)
    k = keys.transpose(0, 2, 1, 3)
    v = values.transpose(0, 2, 1, 3)
    scores = jnp.einsum('bhsd,bhtd->bhst', q, k) / (hd ** 0.5)
    p = jax.nn.softmax(scores.astype(jnp.float32), axis=-1).astype(q.dtype)
    o = jnp.einsum('bhst,bhtd->bhsd', p, v)
    o = o.transpose(0, 2, 1, 3).reshape(B, S, Hq * hd)

    h = x + (o @ params["wo"]).reshape(B, S, D)
    hn = rms(h, params["ffn_norm_w"])
    ff = (jax.nn.silu(hn @ params["w1"]) * (hn @ params["w3"])) @ params["w2"]
    return h + ff, cache_k, cache_v


# ----------------------------------- main ------------------------------------

if __name__ == "__main__":
    # Small ModelArgs-consistent configuration.
    B, S = 2, 8
    dim = 64
    n_heads = 4
    n_kv_heads = 2
    head_dim = dim // n_heads
    multiple_of = 32
    hidden = 4 * dim
    hidden = int(2 * hidden / 3)
    hidden = multiple_of * ((hidden + multiple_of - 1) // multiple_of)   # 192
    max_batch, max_seq = 4, 16
    cfg = dict(n_heads=n_heads, n_kv_heads=n_kv_heads, head_dim=head_dim,
               eps=1e-5, max_batch=max_batch, max_seq=max_seq)
    start_pos = 0

    key = jax.random.PRNGKey(0)
    ks = jax.random.split(key, 10)
    scale = 0.02
    params = dict(
        attn_norm_w=1.0 + 0.1 * jax.random.normal(ks[8], (dim,), jnp.float32),
        ffn_norm_w=1.0 + 0.1 * jax.random.normal(ks[9], (dim,), jnp.float32),
        wq=scale * jax.random.normal(ks[0], (dim, n_heads * head_dim), jnp.float32),
        wk=scale * jax.random.normal(ks[1], (dim, n_kv_heads * head_dim), jnp.float32),
        wv=scale * jax.random.normal(ks[2], (dim, n_kv_heads * head_dim), jnp.float32),
        wo=scale * jax.random.normal(ks[3], (n_heads * head_dim, dim), jnp.float32),
        w1=scale * jax.random.normal(ks[4], (dim, hidden), jnp.float32),
        w3=scale * jax.random.normal(ks[5], (dim, hidden), jnp.float32),
        w2=scale * jax.random.normal(ks[6], (hidden, dim), jnp.float32),
    )
    x = jax.random.normal(ks[7], (B, S, dim), jnp.float32)

    # One-time init: fuse QKV weight + fold norm gains (hoisted out of forward).
    fparams = prepare_params(params)

    # KV cache in the attention-friendly layout (Bmax, Hkv, maxT, hd).
    cache_k = jnp.zeros((max_batch, n_kv_heads, max_seq, head_dim), jnp.float32)
    cache_v = jnp.zeros_like(cache_k)
    # Torch-layout caches for the reference.
    ref_ck0 = jnp.zeros((max_batch, max_seq, n_kv_heads, head_dim), jnp.float32)
    ref_cv0 = jnp.zeros_like(ref_ck0)

    # Rotary frequencies; pairing matches torch.view_as_complex.
    theta = 1.0 / (10000.0 ** (jnp.arange(0, head_dim, 2, dtype=jnp.float32)
                               / head_dim))
    pos = jnp.arange(start_pos, start_pos + S, dtype=jnp.float32)
    freqs = jnp.outer(pos, theta)                 # (S, head_dim//2)
    cos, sin = jnp.cos(freqs), jnp.sin(freqs)

    out, new_ck, new_cv = encoder_block_forward(
        x, start_pos, cos, sin, cache_k, cache_v, fparams, cfg)
    out = jax.block_until_ready(out)

    ref, ref_ck, ref_cv = reference_forward(
        x, start_pos, cos, sin, ref_ck0, ref_cv0, params, cfg)
    ref = jax.block_until_ready(ref)

    assert out.shape == (B, S, dim)
    assert jnp.allclose(out, ref, rtol=1e-2, atol=1e-2), \
        "Pallas output mismatch vs reference"
    assert jnp.allclose(new_ck, ref_ck.transpose(0, 2, 1, 3), rtol=1e-2, atol=1e-2), \
        "K-cache mismatch vs reference"
    assert jnp.allclose(new_cv, ref_cv.transpose(0, 2, 1, 3), rtol=1e-2, atol=1e-2), \
        "V-cache mismatch vs reference"

    print("KERNEL_OK")
</pallas_src>

<mosaic_0001>
module attributes {stable_mosaic.version = 11 : i64} {
  func.func @_rms_matmul_kernel(%arg0: i32, %arg1: i32, %arg2: i32, %arg3: memref<16x64xf32, #tpu.memory_space<vmem>>, %arg4: memref<64x128xf32, #tpu.memory_space<vmem>>, %arg5: memref<16x128xf32, #tpu.memory_space<vmem>>, %arg6: memref<16x128xf32, #tpu.memory_space<vmem>>, %arg7: memref<16x1xf32, #tpu.memory_space<vmem>>) attributes {dimension_semantics = [#tpu.dimension_semantics<parallel>, #tpu.dimension_semantics<parallel>, #tpu.dimension_semantics<arbitrary>], iteration_bounds = array<i64: 1, 1, 1>, scalar_prefetch = 0 : i64, scratch_operands = 2 : i64, tpu.core_type = #tpu.core_type<tc>, window_params = [{transform_indices = @transform_0, window_bounds = array<i64: 16, 64>}, {transform_indices = @transform_1, window_bounds = array<i64: 64, 128>}, {transform_indices = @transform_2, window_bounds = array<i64: 16, 128>}]} {
    %c0_i32 = arith.constant 0 : i32
    %0 = arith.cmpi eq, %arg2, %c0_i32 : i32
    %1 = arith.extui %0 : i1 to i32
    %c0_i32_0 = arith.constant 0 : i32
    %2 = arith.cmpi ne, %1, %c0_i32_0 : i32
    scf.if %2 {
      %cst_15 = arith.constant 0.000000e+00 : f32
      %18 = vector.broadcast %cst_15 : f32 to vector<16x128xf32>
      %c0_16 = arith.constant 0 : index
      %c0_17 = arith.constant 0 : index
      %19 = vector.load %arg6[%c0_16, %c0_17] : memref<16x128xf32, #tpu.memory_space<vmem>>, vector<16x128xf32>
      tpu.vector_store %arg6[%c0_16, %c0_17], %18 {strides = array<i32>} : memref<16x128xf32, #tpu.memory_space<vmem>>, vector<16x128xf32>,
      %cst_18 = arith.constant 0.000000e+00 : f32
      %20 = vector.broadcast %cst_18 : f32 to vector<16x1xf32>
      %c0_19 = arith.constant 0 : index
      %c0_20 = arith.constant 0 : index
      %21 = vector.load %arg7[%c0_19, %c0_20] : memref<16x1xf32, #tpu.memory_space<vmem>>, vector<16x1xf32>
      tpu.vector_store %arg7[%c0_19, %c0_20], %20 {strides = array<i32>} : memref<16x1xf32, #tpu.memory_space<vmem>>, vector<16x1xf32>,
    } else {
    }
    %c0 = arith.constant 0 : index
    %c0_1 = arith.constant 0 : index
    %3 = vector.load %arg3[%c0, %c0_1] : memref<16x64xf32, #tpu.memory_space<vmem>>, vector<16x64xf32>
    %c0_2 = arith.constant 0 : index
    %c0_3 = arith.constant 0 : index
    %4 = vector.load %arg6[%c0_2, %c0_3] : memref<16x128xf32, #tpu.memory_space<vmem>>, vector<16x128xf32>
    %c0_4 = arith.constant 0 : index
    %c0_5 = arith.constant 0 : index
    %5 = vector.load %arg4[%c0_4, %c0_5] : memref<64x128xf32, #tpu.memory_space<vmem>>, vector<64x128xf32>
    %cst = arith.constant dense<0.000000e+00> : vector<16x128xf32>
    %6 = tpu.matmul %3, %5, %cst {dimension_numbers = #tpu.dot_dimension_numbers<[1], [0], [0], [1], [0, 0, 1, 1], [], []>} : vector<16x64xf32>, vector<64x128xf32>, vector<16x128xf32> -> vector<16x128xf32>
    %7 = arith.addf %4, %6 : vector<16x128xf32>
    %c0_6 = arith.constant 0 : index
    %c0_7 = arith.constant 0 : index
    %8 = vector.load %arg6[%c0_6, %c0_7] : memref<16x128xf32, #tpu.memory_space<vmem>>, vector<16x128xf32>
    tpu.vector_store %arg6[%c0_6, %c0_7], %7 {strides = array<i32>} : memref<16x128xf32, #tpu.memory_space<vmem>>, vector<16x128xf32>,
    %c0_8 = arith.constant 0 : index
    %c0_9 = arith.constant 0 : index
    %9 = vector.load %arg7[%c0_8, %c0_9] : memref<16x1xf32, #tpu.memory_space<vmem>>, vector<16x1xf32>
    %10 = arith.mulf %3, %3 : vector<16x64xf32>
    %cst_10 = arith.constant dense<0.000000e+00> : vector<16xf32>
    %11 = vector.multi_reduction <add>, %10, %cst_10 [1] : vector<16x64xf32> to vector<16xf32>
    %12 = vector.shape_cast %11 : vector<16xf32> to vector<16x1xf32>
    %13 = arith.addf %9, %12 : vector<16x1xf32>
    %c0_11 = arith.constant 0 : index
    %c0_12 = arith.constant 0 : index
    %14 = vector.load %arg7[%c0_11, %c0_12] : memref<16x1xf32, #tpu.memory_space<vmem>>, vector<16x1xf32>
    tpu.vector_store %arg7[%c0_11, %c0_12], %13 {strides = array<i32>} : memref<16x1xf32, #tpu.memory_space<vmem>>, vector<16x1xf32>,
    %c0_i32_13 = arith.constant 0 : i32
    %15 = arith.cmpi eq, %arg2, %c0_i32_13 : i32
    %16 = arith.extui %15 : i1 to i32
    %c0_i32_14 = arith.constant 0 : i32
    %17 = arith.cmpi ne, %16, %c0_i32_14 : i32
    scf.if %17 {
      %c0_15 = arith.constant 0 : index
      %c0_16 = arith.constant 0 : index
      %18 = vector.load %arg7[%c0_15, %c0_16] : memref<16x1xf32, #tpu.memory_space<vmem>>, vector<16x1xf32>
      %cst_17 = arith.constant 1.562500e-02 : f32
      %19 = vector.broadcast %cst_17 : f32 to vector<16x1xf32>
      %20 = arith.mulf %18, %19 : vector<16x1xf32>
      %cst_18 = arith.constant 9.99999974E-6 : f32
      %21 = vector.broadcast %cst_18 : f32 to vector<16x1xf32>
      %22 = arith.addf %20, %21 : vector<16x1xf32>
      %23 = math.rsqrt %22 : vector<16x1xf32>
      %c0_19 = arith.constant 0 : index
      %c0_20 = arith.constant 0 : index
      %24 = vector.load %arg6[%c0_19, %c0_20] : memref<16x128xf32, #tpu.memory_space<vmem>>, vector<16x128xf32>
      %25 = vector.broadcast %23 : vector<16x1xf32> to vector<16x128xf32>
      %26 = arith.mulf %24, %25 : vector<16x128xf32>
      %c0_21 = arith.constant 0 : index
      %c0_22 = arith.constant 0 : index
      %27 = vector.load %arg5[%c0_21, %c0_22] : memref<16x128xf32, #tpu.memory_space<vmem>>, vector<16x128xf32>
      tpu.vector_store %arg5[%c0_21, %c0_22], %26 {strides = array<i32>} : memref<16x128xf32, #tpu.memory_space<vmem>>, vector<16x128xf32>,
    } else {
    }
    return
  }
  func.func @transform_0(%arg0: i32, %arg1: i32, %arg2: i32) -> (i32, i32) {
    %c0_i32 = arith.constant 0 : i32
    return %arg0, %arg2 : i32, i32
  }
  func.func @transform_1(%arg0: i32, %arg1: i32, %arg2: i32) -> (i32, i32) {
    %c0_i32 = arith.constant 0 : i32
    return %arg2, %arg1 : i32, i32
  }
  func.func @transform_2(%arg0: i32, %arg1: i32, %arg2: i32) -> (i32, i32) {
    %c0_i32 = arith.constant 0 : i32
    return %arg0, %arg1 : i32, i32
  }
}

</mosaic_0001>

<bundles_post_ra>
// kernel: tpu_custom_call.1
= control target key start
LH: loop header
LB: loop body
LE: loop exit
PB: predicated region body
PF: predicated region fallthrough
CT: control target
= control target key end

     0   :  { %7 = vsyncpa [#allocation5], 0  ;;  %s414_s0 = inlined_call_operand.hbm [shape: f32[16,64], index: 0, kind: input, shape index: {}]   ;;  %s415_s1 = inlined_call_operand.hbm [shape: f32[64,128], index: 1, kind: input, shape index: {}]   ;;  %s416_s2 = inlined_call_operand.hbm [shape: f32[16,128], index: 2, kind: output, shape index: {}]  }
   0x1   :  { %8 = vsyncpa [#allocation8], 0 }
   0x2   :  { %9 = vsyncpa [#allocation6], 0  ;;  %s339_s9 = smov [#allocation4]   ;;  %s267_s13 = scalar_lea.hbm %s414_s0, 256 }
   0x3   :  { %s15_s10 = sshll.u32 %s339_s9, 4  ;;  %p268_p0 = scmp.ne.s32.totalorder %s414_s0, %s267_s13  ;;  %s16_s10 = int_to_ptr.vmem [resolvable:$true] %s15_s10 }
   0x4   :  { %p271_p1 = scmp.lt.u32.totalorder %s267_s13, %s414_s0 }
   0x6   :  { %p273_p2 = pnand %p271_p1, %p268_p0 }
   0x8   :  { %276 = shalt.err (!%p273_p2)
}
   0x9   :  { %s277_s18 = scalar_lea.vmem %s16_s10, 256  ;;  %p282_p4 = scmp.lt.s32.totalorder %s16_s10, %s16_s10 }
   0xa   :  { %p278_p3 = scmp.ne.s32.totalorder %s16_s10, %s277_s18  ;;  %p283_p5 = scmp.lt.s32.totalorder %s277_s18, %s277_s18 }
   0xc   :  { %p284_p6 = por %p283_p5, %p282_p4 }
   0xe   :  { %p285_p7 = pnand %p284_p6, %p278_p3 }
  0x10   :  { %288 = shalt.err (!%p285_p7)
}
  0x11   :  { %s340_s19 = smov 128   ;;  %s341_s20 = smov 8  }
  0x12   :  { %21 = dma.hbm_to_vmem [thread:$0]  %s414_s0, 256, %s16_s10, [#allocation5], %s340_s19, %s340_s19, %s341_s20  }
  0x13   :  { %s342_s23 = smov [#allocation7]   ;;  %s289_s27 = scalar_lea.hbm %s415_s1, 1024 }
  0x14   :  { %s27_s24 = sshll.u32 %s342_s23, 4  ;;  %p290_p8 = scmp.ne.s32.totalorder %s415_s1, %s289_s27  ;;  %s28_s24 = int_to_ptr.vmem [resolvable:$true] %s27_s24 }
  0x15   :  { %p293_p9 = scmp.lt.u32.totalorder %s289_s27, %s415_s1 }
  0x17   :  { %p295_p10 = pnand %p293_p9, %p290_p8 }
  0x19   :  { %298 = shalt.err (!%p295_p10)
}
  0x1a   :  { %s299_s4 = scalar_lea.vmem %s28_s24, 1024  ;;  %p304_p12 = scmp.lt.s32.totalorder %s28_s24, %s28_s24 }
  0x1b   :  { %p300_p11 = scmp.ne.s32.totalorder %s28_s24, %s299_s4  ;;  %p305_p13 = scmp.lt.s32.totalorder %s299_s4, %s299_s4 }
  0x1d   :  { %p306_p0 = por %p305_p13, %p304_p12 }
  0x1f   :  { %p307_p1 = pnand %p306_p0, %p300_p11 }
  0x21   :  { %310 = shalt.err (!%p307_p1)
}
  0x22   :  { %33 = dma.hbm_to_vmem [thread:$0]  %s415_s1, 1024, %s28_s24, [#allocation8], %s340_s19, %s340_s19, %s341_s20  }
  0x23   :  { %333 = dma.done.wait [#allocation5], 256  }
  0x24   :  { %334 = vsyncadd [#allocation5], 4294967040 }
  0x25   :  { %335 = dma.done.wait [#allocation8], 1024  }
  0x26   :  { %336 = vsyncadd [#allocation8], 4294966272  ;;  %vm46_vm0 = vcmask 7168   ;;  %v343_v0 = vmov 0.0   ;;  %v49_v1 = vld [vmem:[#allocation4] sm:$0xff]  ;;  %vm61_vm1 = vcmask 523264  }
  0x27   :  { %47 = vst.msk [vmem:[#allocation3] sm:$0xff] %vm46_vm0, %v343_v0  ;;  %48 = vst.msk [vmem:[#allocation3 + $0x8] sm:$0xff] %vm46_vm0, %v343_v0  ;;  %v50_v2 = vld [vmem:[#allocation4 + $0x8] sm:$0xff]  ;;  %v53_v3 = vld [vmem:[#allocation7] sm:$0xff]  ;;  %v149_v4 = vmul.f32 %v49_v1, %v49_v1  ;;  %235 = vmatprep.mubr.msk.f32.mxu0 %vm61_vm1, %v49_v1  ;;  %v344_v19 = vmov 0   ;;  %s345_s1 = smov [#allocation9]  }
  0x28   :  { %v150_v5 = vmul.f32 %v50_v2, %v50_v2  ;;  %v54_v6 = vld [vmem:[#allocation7 + $0x8] sm:$0xff]  ;;  %v55_v7 = vld [vmem:[#allocation7 + $0x10] sm:$0xff]  ;;  %v56_v8 = vld [vmem:[#allocation7 + $0x18] sm:$0xff]  ;;  %261 = vset.pattern.permute.xlu1 %v344_v19  ;;  %262 = vset.pattern.permute.xlu0 %v344_v19  ;;  %s194_s6 = sshll.u32 %s345_s1, 4  ;;  %s195_s6 = int_to_ptr.vmem [resolvable:$true] %s194_s6 }
  0x29   :  { %v238_v9 = vpack.c.bf16 %v54_v6, %v53_v3  ;;  %v242_v10 = vpack.c.bf16 %v56_v8, %v55_v7  ;;  %v151_v11 = vsel %vm61_vm1, %v149_v4, 0.0  ;;  %v57_v12 = vld [vmem:[#allocation7 + $0x20] sm:$0xff]  ;;  %v58_v13 = vld [vmem:[#allocation7 + $0x28] sm:$0xff]  ;;  %v59_v16 = vld [vmem:[#allocation7 + $0x30] sm:$0xff]  ;;  %s311_s7 = scalar_lea.vmem %s195_s6, 256  ;;  %p316_p3 = scmp.lt.s32.totalorder %s195_s6, %s195_s6 }
  0x2a   :  { %152 = vadd.xlane.f32.xlu0 %v151_v11  ;;  %v154_v14 = vsel %vm61_vm1, %v150_v5, 0.0  ;;  %v246_v15 = vpack.c.bf16 %v58_v13, %v57_v12  ;;  %v60_v17 = vld [vmem:[#allocation7 + $0x38] sm:$0xff]  ;;  %p312_p2 = scmp.ne.s32.totalorder %s195_s6, %s311_s7  ;;  %p317_p4 = scmp.lt.s32.totalorder %s311_s7, %s311_s7 }
  0x2b   :  { %239 = vmatprep.subr.bf16.mxu0 %v238_v9  ;;  %v250_v18 = vpack.c.bf16 %v60_v17, %v59_v16 }
  0x2c   :  { %241 = vmatpush3.bf16.msra.mxu0 %v238_v9  ;;  %p318_p5 = por %p317_p4, %p316_p3 }
  0x2d   :  { %243 = vmatprep.subr.bf16.mxu0 %v242_v10 }
  0x2e   :  { %155 = vadd.xlane.f32.xlu0 %v154_v14  ;;  %v147_v20 = vld [vmem:[#allocation3] sm:$0xff]  ;;  %v148_v23 = vld [vmem:[#allocation3 + $0x8] sm:$0xff]  ;;  %p319_p6 = pnand %p318_p5, %p312_p2 }
  0x30   :  { %245 = vmatpush3.bf16.msra.mxu0 %v242_v10 }
  0x31   :  { %247 = vmatprep.subr.bf16.mxu0 %v246_v15 }
  0x34   :  { %249 = vmatpush3.bf16.msra.mxu0 %v246_v15 }
  0x35   :  { %251 = vmatprep.subr.bf16.mxu0 %v250_v18 }
  0x38   :  { %253 = vmatpush3.bf16.msra.mxu0 %v250_v18 }
  0x3b   :  { %236 = vmatmul.mubr.msk.f32.vlgmr.msra.gmra.mrb[0].mxu0 %vm61_vm1, %v50_v2 }
  0xb7   :  { %v153_v21 = vpop.xlane.xlu0 %152 }
  0xb8   :  { %v157_v22 = vadd.f32 %v153_v21, %v147_v20 }
  0xba   :  { %160 = vst.msk [vmem:[#allocation3] sm:$0xff] %vm46_vm0, %v157_v22 }
  0xbb   :  { %v156_v24 = vpop.xlane.xlu0 %155 }
  0xbc   :  { %v158_v25 = vadd.f32 %v156_v24, %v148_v23 }
  0xbe   :  { %161 = vst.msk [vmem:[#allocation3 + $0x8] sm:$0xff] %vm46_vm0, %v158_v25 }
  0xc1   :  { %v165_v26 = vld [vmem:[#allocation3] sm:$0xff] }
  0xc2   :  { %v167_v27 = vmul.f32 0.015625, %v165_v26 }
  0xc4   :  { %v169_v28 = vadd.f32 1e-05, %v167_v27 }
  0xc5   :  { %v166_v29 = vld [vmem:[#allocation3 + $0x8] sm:$0xff] }
  0xc6   :  { %263 = vrsqrt.f32 %v169_v28  ;;  %v168_v30 = vmul.f32 0.015625, %v166_v29 }
  0xc8   :  { %v170_v31 = vadd.f32 1e-05, %v168_v30 }
  0xca   :  { %265 = vrsqrt.f32 %v170_v31 }
  0xd0   :  { %v264_v32 = vpop.eup %263 }
  0xd1   :  { %177 = vperm.xlu1 %261, %v264_v32  }
  0xd4   :  { %v266_v33 = vpop.eup %265 }
  0xd5   :  { %182 = vperm.xlu1 %261, %v266_v33  }
 0x10e   :  { %v237_v34 = vpop.f32.mrb[0].mxu0 }
 0x10f   :  { %v134_v35 = vpop.f32.mrb[1].mxu0 }
 0x150   :  { %v178_v36 = vpop.permute.xlu1 %177 }
 0x151   :  { %v185_v37 = vmul.f32 %v178_v36, %v134_v35 }
 0x153   :  { %187 = vst [vmem:[#allocation9] sm:$0xff] %v185_v37 }
 0x154   :  { %v183_v38 = vpop.permute.xlu1 %182 }
 0x155   :  { %v186_v39 = vmul.f32 %v237_v34, %v183_v38 }
 0x157   :  { %188 = vst [vmem:[#allocation9 + $0x8] sm:$0xff] %v186_v39 }
 0x158   :  { %322 = shalt.err (!%p319_p6)
}
 0x159   :  { %s323_s10 = scalar_lea.hbm %s416_s2, 256 }
 0x15a   :  { %p324_p7 = scmp.ne.s32.totalorder %s416_s2, %s323_s10  ;;  %p327_p8 = scmp.lt.u32.totalorder %s323_s10, %s416_s2 }
 0x15c   :  { %p329_p9 = pnand %p327_p8, %p324_p7 }
 0x15e   :  { %332 = shalt.err (!%p329_p9)
}
 0x15f   :  { %200 = dma.vmem_to_hbm [thread:$0]  %s195_s6, 256, %s416_s2, [#allocation6], %s340_s19, %s340_s19, %s341_s20  }
 0x160   :  { %337 = dma.done.wait [#allocation6], 256  }
 0x161   :  { %338 = vsyncadd [#allocation6], 4294967040 }
 0x162   :  { %204 = vsyncpa [#allocation5], 1 }
 0x163   :  { %205 = vsyncpa [#allocation8], 1 }
 0x164   :  { %206 = vsyncpa [#allocation6], 1 }

</bundles_post_ra>
